<compile_context>
chip_gen: v6e
topology: v6e:2x2x1
jax: 0.10.0
libtpu: 0.0.40
codegen_flags: <defaults>
</compile_context>

<pallas_src>
import math
import functools

import jax
import jax.numpy as jnp
from jax.experimental import pallas as pl
from jax.experimental.pallas import tpu as pltpu


_TWO_PI = 2.0 * math.pi
_INV_TWO_PI = 1.0 / _TWO_PI

# Odd polynomial coefficients for sin on [-pi, pi] (Taylor up to x^15,
# highest degree first).  Max error vs true sin on [-pi, pi] is ~8e-7 plus a
# few ulps of evaluation rounding -- far below the 1e-4 check tolerance.
_SIN_ODD_COEFFS = (
    -7.647163731819816e-13,   # -1/15!
     1.605904383682161e-10,   #  1/13!
    -2.505210838544172e-08,   # -1/11!
     2.755731922398589e-06,   #  1/9!
    -1.984126984126984e-04,   # -1/7!
     8.333333333333333e-03,   #  1/5!
    -1.666666666666667e-01,   # -1/3!
     1.0,                     #  x
)


def _sin_folded(z):
    """sin(z) for |z| <~ 4*pi: fold to [-pi, pi], then odd Horner polynomial.

    Much cheaper on the VPU (the binding slot on v6e/v7x) than jnp.sin's
    general-purpose range reduction.  Only used when normalize=True, where the
    argument is bounded to [0, 2.5*pi).
    """
    n = jnp.floor(z * _INV_TWO_PI + 0.5)     # round(z / 2pi), floor lowers cheaply
    r = z - n * _TWO_PI                      # r in [-pi, pi]
    u = r * r
    p = _SIN_ODD_COEFFS[0]
    for c in _SIN_ODD_COEFFS[1:]:
        p = p * u + c
    return r * p


def _pos_embed_sine_kernel(y_ref, x_ref, out_ref, *, num_pos_feats, temperature,
                           use_poly_sin):
    # y_ref   : (1, 1, tS)  f32  normalized y_embed for this spatial tile
    # x_ref   : (1, 1, tS)  f32  normalized x_embed for this spatial tile
    # out_ref : (1, 2F, tS)      channel-major output tile (NCHW layout)
    F = num_pos_feats

    # Per-channel constants, generated in-kernel (F elements; EUP/VPU slack):
    #   inv_dim_t[c] = temperature ** (-2*floor(c/2)/F)
    #   phase[c]     = (c % 2) * pi/2        (so cos(z) == sin(z + pi/2))
    k = jax.lax.broadcasted_iota(jnp.int32, (F, 1), 0).astype(jnp.float32)
    half = jnp.floor(k * 0.5)
    inv_t = jnp.exp(half * (-2.0 * math.log(temperature) / F))     # (F, 1)
    phase = (k - 2.0 * half) * (0.5 * math.pi)                     # (F, 1)

    y = y_ref[0]                     # (1, tS)
    x = x_ref[0]                     # (1, tS)

    sin_fn = _sin_folded if use_poly_sin else jnp.sin
    # Channel c: even -> sin(embed * inv_dim_t[c]), odd -> cos(...) == sin(...+pi/2).
    out_ref[0, :F, :] = sin_fn(inv_t * y + phase).astype(out_ref.dtype)  # pos_y
    out_ref[0, F:, :] = sin_fn(inv_t * x + phase).astype(out_ref.dtype)  # pos_x


def _pick_spatial_tile(hw, num_pos_feats, batch):
    """Byte-budget spatial tile (multiple of 128 lanes).

    Targets an output block of ~2 MiB (2F * tS * 4B), i.e. ~4 MiB when
    double-buffered plus tiny input buffers -- comfortably inside the scoped
    VMEM defaults on v5e / v6e and v7x's 64 MiB -- then shrinks the tile until
    the grid has >= 4 total steps so the "parallel" axes can shard across
    v7x's 2 TensorCores.
    """
    target_bytes = 2 * 1024 * 1024
    bytes_per_lane = 8 * num_pos_feats                 # 2F channels * 4 B (f32 math)
    ts = max(128, (target_bytes // bytes_per_lane) // 128 * 128)
    hw_padded = ((hw + 127) // 128) * 128
    ts = min(ts, hw_padded)
    while ts > 128 and batch * ((hw + ts - 1) // ts) < 4:
        ts = max(128, (ts // 2) // 128 * 128)
    return ts


class PositionEmbeddingSinePallas:
    """Pallas TPU implementation of PositionEmbeddingSine (no learned params)."""

    def __init__(self, num_pos_feats=128, temperature=10000, normalize=True,
                 out_dtype=jnp.float32):
        assert num_pos_feats % 2 == 0, "num_pos_feats must be even"
        self.num_pos_feats = num_pos_feats
        self.temperature = float(temperature)
        self.normalize = normalize
        self.scale = 2.0 * math.pi
        self.eps = 1e-06
        # bf16 output is the big lever on HBM-writeback-bound v5e; default f32
        # matches the PyTorch module (math is always done in f32).
        self.out_dtype = out_dtype

    def __call__(self, img, mask):
        # img:  (B, C, H, W)  -- only used for layout parity (values unused)
        # mask: (B, 1, H, W)  bool, True = padded position
        assert mask is not None
        del img
        B, _, H, W = mask.shape
        F = self.num_pos_feats
        HW = H * W

        # --- tiny pre-pass (B*H*W floats): cumsums + normalization ----------
        not_mask = (~mask[:, 0, :, :]).astype(jnp.float32)          # (B, H, W)
        y_embed = jnp.cumsum(not_mask, axis=1)
        x_embed = jnp.cumsum(not_mask, axis=2)
        if self.normalize:
            y_embed = y_embed / (y_embed[:, -1:, :] + self.eps) * self.scale
            x_embed = x_embed / (x_embed[:, :, -1:] + self.eps) * self.scale
        y_flat = y_embed.reshape(B, 1, HW)
        x_flat = x_embed.reshape(B, 1, HW)

        # --- Pallas kernel: (B, 2F, HW) channel-major, lane-dense spatial ---
        tS = _pick_spatial_tile(HW, F, B)
        grid = (B, pl.cdiv(HW, tS))          # cdiv grid: tail block masked by Pallas

        kernel = functools.partial(
            _pos_embed_sine_kernel,
            num_pos_feats=F,
            temperature=self.temperature,
            # Polynomial sin requires the bounded argument of normalize=True.
            use_poly_sin=self.normalize,
        )

        out_flat = pl.pallas_call(
            kernel,
            out_shape=jax.ShapeDtypeStruct((B, 2 * F, HW), self.out_dtype),
            grid_spec=pltpu.PrefetchScalarGridSpec(
                num_scalar_prefetch=0,
                grid=grid,
                in_specs=[
                    pl.BlockSpec((1, 1, tS), lambda b, s: (b, 0, s)),  # y_embed
                    pl.BlockSpec((1, 1, tS), lambda b, s: (b, 0, s)),  # x_embed
                ],
                out_specs=pl.BlockSpec((1, 2 * F, tS), lambda b, s: (b, 0, s)),
            ),
            compiler_params=pltpu.CompilerParams(
                dimension_semantics=("parallel", "parallel"),
                # Explicit, generation-safe budget: the double-buffered ~2 MiB
                # output block + input buffers are far below this everywhere.
                # Pipelining depth stays at the default 2 (compute per block
                # already exceeds its DMA time; deeper buffers just burn VMEM).
                vmem_limit_bytes=32 * 1024 * 1024,
            ),
        )(y_flat, x_flat)

        # Row-major (B, 2F, H*W) -> (B, 2F, H, W): free reshape, no transpose.
        return out_flat.reshape(B, 2 * F, H, W)


def _reference(mask, num_pos_feats, temperature=10000, normalize=True):
    """Pure-JAX port of the PyTorch forward for correctness checking."""
    scale = 2.0 * math.pi
    eps = 1e-06
    not_mask = (~mask[:, 0, :, :]).astype(jnp.float32)
    y_embed = jnp.cumsum(not_mask, axis=1)
    x_embed = jnp.cumsum(not_mask, axis=2)
    if normalize:
        y_embed = y_embed / (y_embed[:, -1:, :] + eps) * scale
        x_embed = x_embed / (x_embed[:, :, -1:] + eps) * scale
    dim_t = jnp.arange(num_pos_feats, dtype=jnp.float32)
    dim_t = temperature ** (2.0 * jnp.floor(dim_t / 2.0) / num_pos_feats)
    pos_x = x_embed[:, :, :, None] / dim_t
    pos_y = y_embed[:, :, :, None] / dim_t
    B, H, W, _ = pos_x.shape
    pos_x = jnp.stack((jnp.sin(pos_x[..., 0::2]), jnp.cos(pos_x[..., 1::2])),
                      axis=4).reshape(B, H, W, -1)
    pos_y = jnp.stack((jnp.sin(pos_y[..., 0::2]), jnp.cos(pos_y[..., 1::2])),
                      axis=4).reshape(B, H, W, -1)
    pos = jnp.concatenate((pos_y, pos_x), axis=3)
    return jnp.transpose(pos, (0, 3, 1, 2))


if __name__ == "__main__":
    key = jax.random.PRNGKey(0)
    B, C, H, W = 2, 4, 16, 16
    F = 16  # num_pos_feats (small, even)

    kimg, kmask = jax.random.split(key)
    img = jax.random.normal(kimg, (B, C, H, W), dtype=jnp.float32)
    mask = jax.random.bernoulli(kmask, 0.2, (B, 1, H, W))   # bool, True = pad

    module = PositionEmbeddingSinePallas(num_pos_feats=F)
    pos = jax.block_until_ready(module(img, mask))

    assert pos.shape == (B, 2 * F, H, W), pos.shape
    assert pos.dtype == jnp.float32

    ref = _reference(mask, F)
    max_err = float(jnp.max(jnp.abs(pos - ref)))
    assert jnp.allclose(pos, ref, atol=1e-4, rtol=1e-4), max_err

    print("KERNEL_OK")
</pallas_src>

<mosaic_0001>
module attributes {stable_mosaic.version = 11 : i64} {
  func.func @_pos_embed_sine_kernel(%arg0: i32, %arg1: i32, %arg2: memref<1x1x128xf32, #tpu.memory_space<vmem>>, %arg3: memref<1x1x128xf32, #tpu.memory_space<vmem>>, %arg4: memref<1x32x128xf32, #tpu.memory_space<vmem>>) attributes {dimension_semantics = [#tpu.dimension_semantics<parallel>, #tpu.dimension_semantics<parallel>], iteration_bounds = array<i64: 2, 2>, scalar_prefetch = 0 : i64, scratch_operands = 0 : i64, tpu.core_type = #tpu.core_type<tc>, window_params = [{transform_indices = @transform_0, window_bounds = array<i64: 1, 1, 128>}, {transform_indices = @transform_1, window_bounds = array<i64: 1, 1, 128>}, {transform_indices = @transform_2, window_bounds = array<i64: 1, 32, 128>}]} {
    %0 = tpu.iota {dimensions = array<i32: 0>} : vector<16x1xi32>
    %1 = arith.sitofp %0 : vector<16x1xi32> to vector<16x1xf32>
    %cst = arith.constant 5.000000e-01 : f32
    %2 = vector.broadcast %cst : f32 to vector<16x1xf32>
    %3 = arith.mulf %1, %2 : vector<16x1xf32>
    %4 = math.floor %3 : vector<16x1xf32>
    %cst_0 = arith.constant -1.15129256 : f32
    %5 = vector.broadcast %cst_0 : f32 to vector<16x1xf32>
    %6 = arith.mulf %4, %5 : vector<16x1xf32>
    %7 = math.exp %6 : vector<16x1xf32>
    %cst_1 = arith.constant 2.000000e+00 : f32
    %8 = vector.broadcast %cst_1 : f32 to vector<16x1xf32>
    %9 = arith.mulf %8, %4 : vector<16x1xf32>
    %10 = arith.subf %1, %9 : vector<16x1xf32>
    %cst_2 = arith.constant 1.57079637 : f32
    %11 = vector.broadcast %cst_2 : f32 to vector<16x1xf32>
    %12 = arith.mulf %10, %11 : vector<16x1xf32>
    %c0 = arith.constant 0 : index
    %c0_3 = arith.constant 0 : index
    %c0_4 = arith.constant 0 : index
    %13 = vector.load %arg2[%c0, %c0_3, %c0_4] : memref<1x1x128xf32, #tpu.memory_space<vmem>>, vector<1x1x128xf32>
    %14 = vector.shape_cast %13 : vector<1x1x128xf32> to vector<1x128xf32>
    %c0_5 = arith.constant 0 : index
    %c0_6 = arith.constant 0 : index
    %c0_7 = arith.constant 0 : index
    %15 = vector.load %arg3[%c0_5, %c0_6, %c0_7] : memref<1x1x128xf32, #tpu.memory_space<vmem>>, vector<1x1x128xf32>
    %16 = vector.shape_cast %15 : vector<1x1x128xf32> to vector<1x128xf32>
    %17 = vector.broadcast %7 : vector<16x1xf32> to vector<16x128xf32>
    %18 = vector.broadcast %14 : vector<1x128xf32> to vector<16x128xf32>
    %19 = arith.mulf %17, %18 : vector<16x128xf32>
    %20 = vector.broadcast %12 : vector<16x1xf32> to vector<16x128xf32>
    %21 = arith.addf %19, %20 : vector<16x128xf32>
    %cst_8 = arith.constant 0.159154937 : f32
    %22 = vector.broadcast %cst_8 : f32 to vector<16x128xf32>
    %23 = arith.mulf %21, %22 : vector<16x128xf32>
    %cst_9 = arith.constant 5.000000e-01 : f32
    %24 = vector.broadcast %cst_9 : f32 to vector<16x128xf32>
    %25 = arith.addf %23, %24 : vector<16x128xf32>
    %26 = math.floor %25 : vector<16x128xf32>
    %cst_10 = arith.constant 6.28318548 : f32
    %27 = vector.broadcast %cst_10 : f32 to vector<16x128xf32>
    %28 = arith.mulf %26, %27 : vector<16x128xf32>
    %29 = arith.subf %21, %28 : vector<16x128xf32>
    %30 = arith.mulf %29, %29 : vector<16x128xf32>
    %cst_11 = arith.constant -7.6471636E-13 : f32
    %31 = vector.broadcast %cst_11 : f32 to vector<16x128xf32>
    %32 = arith.mulf %31, %30 : vector<16x128xf32>
    %cst_12 = arith.constant 1.60590444E-10 : f32
    %33 = vector.broadcast %cst_12 : f32 to vector<16x128xf32>
    %34 = arith.addf %32, %33 : vector<16x128xf32>
    %35 = arith.mulf %34, %30 : vector<16x128xf32>
    %cst_13 = arith.constant -2.50521079E-8 : f32
    %36 = vector.broadcast %cst_13 : f32 to vector<16x128xf32>
    %37 = arith.addf %35, %36 : vector<16x128xf32>
    %38 = arith.mulf %37, %30 : vector<16x128xf32>
    %cst_14 = arith.constant 2.75573188E-6 : f32
    %39 = vector.broadcast %cst_14 : f32 to vector<16x128xf32>
    %40 = arith.addf %38, %39 : vector<16x128xf32>
    %41 = arith.mulf %40, %30 : vector<16x128xf32>
    %cst_15 = arith.constant -1.98412701E-4 : f32
    %42 = vector.broadcast %cst_15 : f32 to vector<16x128xf32>
    %43 = arith.addf %41, %42 : vector<16x128xf32>
    %44 = arith.mulf %43, %30 : vector<16x128xf32>
    %cst_16 = arith.constant 0.00833333377 : f32
    %45 = vector.broadcast %cst_16 : f32 to vector<16x128xf32>
    %46 = arith.addf %44, %45 : vector<16x128xf32>
    %47 = arith.mulf %46, %30 : vector<16x128xf32>
    %cst_17 = arith.constant -0.166666672 : f32
    %48 = vector.broadcast %cst_17 : f32 to vector<16x128xf32>
    %49 = arith.addf %47, %48 : vector<16x128xf32>
    %50 = arith.mulf %49, %30 : vector<16x128xf32>
    %cst_18 = arith.constant 1.000000e+00 : f32
    %51 = vector.broadcast %cst_18 : f32 to vector<16x128xf32>
    %52 = arith.addf %50, %51 : vector<16x128xf32>
    %53 = arith.mulf %29, %52 : vector<16x128xf32>
    %c0_19 = arith.constant 0 : index
    %c0_20 = arith.constant 0 : index
    %c0_21 = arith.constant 0 : index
    %54 = vector.load %arg4[%c0_19, %c0_20, %c0_21] : memref<1x32x128xf32, #tpu.memory_space<vmem>>, vector<1x16x128xf32>
    %55 = vector.shape_cast %54 : vector<1x16x128xf32> to vector<16x128xf32>
    %56 = vector.shape_cast %53 : vector<16x128xf32> to vector<1x16x128xf32>
    tpu.vector_store %arg4[%c0_19, %c0_20, %c0_21], %56 {strides = array<i32>} : memref<1x32x128xf32, #tpu.memory_space<vmem>>, vector<1x16x128xf32>,
    %57 = vector.broadcast %7 : vector<16x1xf32> to vector<16x128xf32>
    %58 = vector.broadcast %16 : vector<1x128xf32> to vector<16x128xf32>
    %59 = arith.mulf %57, %58 : vector<16x128xf32>
    %60 = vector.broadcast %12 : vector<16x1xf32> to vector<16x128xf32>
    %61 = arith.addf %59, %60 : vector<16x128xf32>
    %cst_22 = arith.constant 0.159154937 : f32
    %62 = vector.broadcast %cst_22 : f32 to vector<16x128xf32>
    %63 = arith.mulf %61, %62 : vector<16x128xf32>
    %cst_23 = arith.constant 5.000000e-01 : f32
    %64 = vector.broadcast %cst_23 : f32 to vector<16x128xf32>
    %65 = arith.addf %63, %64 : vector<16x128xf32>
    %66 = math.floor %65 : vector<16x128xf32>
    %cst_24 = arith.constant 6.28318548 : f32
    %67 = vector.broadcast %cst_24 : f32 to vector<16x128xf32>
    %68 = arith.mulf %66, %67 : vector<16x128xf32>
    %69 = arith.subf %61, %68 : vector<16x128xf32>
    %70 = arith.mulf %69, %69 : vector<16x128xf32>
    %cst_25 = arith.constant -7.6471636E-13 : f32
    %71 = vector.broadcast %cst_25 : f32 to vector<16x128xf32>
    %72 = arith.mulf %71, %70 : vector<16x128xf32>
    %cst_26 = arith.constant 1.60590444E-10 : f32
    %73 = vector.broadcast %cst_26 : f32 to vector<16x128xf32>
    %74 = arith.addf %72, %73 : vector<16x128xf32>
    %75 = arith.mulf %74, %70 : vector<16x128xf32>
    %cst_27 = arith.constant -2.50521079E-8 : f32
    %76 = vector.broadcast %cst_27 : f32 to vector<16x128xf32>
    %77 = arith.addf %75, %76 : vector<16x128xf32>
    %78 = arith.mulf %77, %70 : vector<16x128xf32>
    %cst_28 = arith.constant 2.75573188E-6 : f32
    %79 = vector.broadcast %cst_28 : f32 to vector<16x128xf32>
    %80 = arith.addf %78, %79 : vector<16x128xf32>
    %81 = arith.mulf %80, %70 : vector<16x128xf32>
    %cst_29 = arith.constant -1.98412701E-4 : f32
    %82 = vector.broadcast %cst_29 : f32 to vector<16x128xf32>
    %83 = arith.addf %81, %82 : vector<16x128xf32>
    %84 = arith.mulf %83, %70 : vector<16x128xf32>
    %cst_30 = arith.constant 0.00833333377 : f32
    %85 = vector.broadcast %cst_30 : f32 to vector<16x128xf32>
    %86 = arith.addf %84, %85 : vector<16x128xf32>
    %87 = arith.mulf %86, %70 : vector<16x128xf32>
    %cst_31 = arith.constant -0.166666672 : f32
    %88 = vector.broadcast %cst_31 : f32 to vector<16x128xf32>
    %89 = arith.addf %87, %88 : vector<16x128xf32>
    %90 = arith.mulf %89, %70 : vector<16x128xf32>
    %cst_32 = arith.constant 1.000000e+00 : f32
    %91 = vector.broadcast %cst_32 : f32 to vector<16x128xf32>
    %92 = arith.addf %90, %91 : vector<16x128xf32>
    %93 = arith.mulf %69, %92 : vector<16x128xf32>
    %c0_33 = arith.constant 0 : index
    %c16 = arith.constant 16 : index
    %c0_34 = arith.constant 0 : index
    %94 = vector.load %arg4[%c0_33, %c16, %c0_34] : memref<1x32x128xf32, #tpu.memory_space<vmem>>, vector<1x16x128xf32>
    %95 = vector.shape_cast %94 : vector<1x16x128xf32> to vector<16x128xf32>
    %96 = vector.shape_cast %93 : vector<16x128xf32> to vector<1x16x128xf32>
    tpu.vector_store %arg4[%c0_33, %c16, %c0_34], %96 {strides = array<i32>} : memref<1x32x128xf32, #tpu.memory_space<vmem>>, vector<1x16x128xf32>,
    return
  }
  func.func @transform_0(%arg0: i32, %arg1: i32) -> (i32, i32, i32) {
    %c0_i32 = arith.constant 0 : i32
    %c0_i32_0 = arith.constant 0 : i32
    return %arg0, %c0_i32, %arg1 : i32, i32, i32
  }
  func.func @transform_1(%arg0: i32, %arg1: i32) -> (i32, i32, i32) {
    %c0_i32 = arith.constant 0 : i32
    %c0_i32_0 = arith.constant 0 : i32
    return %arg0, %c0_i32, %arg1 : i32, i32, i32
  }
  func.func @transform_2(%arg0: i32, %arg1: i32) -> (i32, i32, i32) {
    %c0_i32 = arith.constant 0 : i32
    %c0_i32_0 = arith.constant 0 : i32
    return %arg0, %c0_i32, %arg1 : i32, i32, i32
  }
}

</mosaic_0001>

<bundles_post_ra>
// kernel: tpu_custom_call.1
= control target key start
LH: loop header
LB: loop body
LE: loop exit
PB: predicated region body
PF: predicated region fallthrough
CT: control target
= control target key end

     0   :  { %7 = vsyncpa [#allocation3], 0  ;;  %s971_s0 = inlined_call_operand.hbm [shape: f32[2,1,256], index: 0, kind: input, shape index: {}]   ;;  %s972_s1 = inlined_call_operand.hbm [shape: f32[2,1,256], index: 1, kind: input, shape index: {}]   ;;  %s973_s2 = inlined_call_operand.hbm [shape: f32[2,32,256], index: 2, kind: output, shape index: {}]  }
   0x1   :  { %9 = vsyncpa [#allocation3 + $0x1], 0 }
   0x2   :  { %10 = vsyncpa [#allocation6], 0 }
   0x3   :  { %12 = vsyncpa [#allocation6 + $0x1], 0 }
   0x4   :  { %13 = vsyncpa [#allocation4], 0 }
   0x5   :  { %15 = vsyncpa [#allocation4 + $0x1], 0  ;;  %s751_s9 = smov 0   ;;  %s753_s10 = smov 0  }
   0x6   :  { %s755_s11 = smov 0   ;;  %s757_s12 = smov 0  }
   0x7   :  { %s759_s13 = smov 0   ;;  %s761_s14 = smov 0  }
   0x8   :  { %s763_s15 = smov 0   ;;  %s765_s16 = smov 0  }
   0x9 LB: > { %s465_s17 = sadd.s32 4294967295, %s728_s16   ;;  %s466_s18 = sadd.s32 4294967294, %s728_s16   ;;  %s728_s16 = sphi %s765_s16, %s21_s16   ;;  %s724_s15 = sphi %s763_s15, %s986_s15   ;;  %s720_s14 = sphi %s761_s14, %s985_s14   ;;  %s716_s13 = sphi %s759_s13, %s984_s13   ;;  %s712_s12 = sphi %s757_s12, %s983_s12   ;;  %s708_s11 = sphi %s755_s11, %s982_s11   ;;  %s704_s10 = sphi %s753_s10, %s981_s10   ;;  %s700_s9 = sphi %s751_s9, %s980_s9  }
   0xa   : > { %s30_s19 = sadd.s32 1, %s720_s14  ;;  %s33_s20 = sadd.s32 1, %s724_s15 }
   0xb   : > { %p31_p0 = scmp.ge.s32.totalorder %s30_s19, 2  ;;  %s42_s21 = sadd.s32 1, %s708_s11 }
   0xc   : > { %p49_p1 = scmp.ne.s32.totalorder %s708_s11, %s704_s10  ;;  %p50_p2 = scmp.eq.s32.totalorder %s728_s16, 0 }
   0xd   : > { %s988_s19 = smov (%p31_p0, %s30_s19), 0  ;;  %s990_s20 = smov (!%p31_p0, %s33_s20), %s724_s15 }
   0xe   : > { %s38_s22 = ssub.s32 %s720_s14, %s988_s19  ;;  %p804_p3 = por %p50_p2, %p49_p1 }
   0xf   : > { %p35_p4 = scmp.ge.s32.totalorder %s990_s20, 2  ;;  %p55_p5 = scmp.ne.s32.totalorder %s704_s10, %s700_s9 }
  0x10   : > { %p56_p6 = scmp.eq.s32.totalorder %s465_s17, 0  ;;  %p109_p7 = scmp.eq.s32.totalorder %s465_s17, 3 }
  0x11   : > { %s992_s20 = smov (%p35_p4, %s990_s20), 0  ;;  %p115_p10 = scmp.eq.s32.totalorder %s466_s18, 3 }
  0x12   : > { %p812_p8 = por %p56_p6, %p55_p5  ;;  %p816_p9 = por %p109_p7, %p49_p1 }
  0x13   : > { %s37_s26 = ssub.s32 %s724_s15, %s992_s20  ;;  %p822_p12 = por %p115_p10, %p55_p5 }
  0x14   : > { %s39_s27 = sor.u32 %s38_s22, %s37_s26  ;;  %p499_p13 = scmp.lt.s32.totalorder %s728_s16, 4 }
  0x15   : > { %p40_p11 = scmp.eq.s32.totalorder %s39_s27, 0  ;;  %s828_s29 = sand.u32 1, %s708_s11  }
  0x16   : > { %s469_s3 = sshll.u32 %s724_s15, 1  ;;  %s138_s4 = scalar_lea.vmem [#allocation2], %s828_s29 }
  0x17   : > { %s831_s30 = scalar_select %p40_p11, %s708_s11, %s42_s21  }
  0x18   : > { %s147_s5 = sshll.u32 %s138_s4, 4  ;;  %s143_s6 = sadd.s32 %s720_s14, %s469_s3  ;;  %s148_s5 = int_to_ptr.vmem [resolvable:$true] %s147_s5 }
  0x19   : > { %s470_s7 = sshll.u32 %s143_s6, 4  ;;  %p838_p0 = pnand %p499_p13, %p804_p3 }
  0x1a   : > { %s145_s22 = scalar_lea.hbm %s971_s0, %s470_s7  ;;  %p473_p1 = scmp.ge.s32.totalorder %s728_s16, 1 }
  0x1b   : > { %p171_p2 = scmp.lt.s32.totalorder %s728_s16, 5  ;;  %s136_s21 = scalar_lea.sflag [#allocation3], %s828_s29 }
  0x1c   : > { %p574_p4 = pneg %p838_p0  ;;  %s585_s26 = scalar_lea.vmem %s148_s5, 16 }
  0x1d   : > { %p586_p5 = scmp.ne.s32.totalorder %s148_s5, %s585_s26  ;;  %s730_s23 = smov [#allocation2]  }
  0x1e   : > { %s590_s27 = sshll.u32 %s730_s23, 4  ;;  %s591_s27 = int_to_ptr.vmem [resolvable:$false] %s590_s27 }
  0x1f   : > { %p588_p6 = pnand %p586_p5, %p574_p4  ;;  %s592_s3 = scalar_lea.vmem %s591_s27, 32 }
  0x20   : > { %p593_p7 = scmp.lt.s32.totalorder %s148_s5, %s591_s27  ;;  %p594_p10 = scmp.lt.s32.totalorder %s592_s3, %s585_s26 }
  0x21   : > { %p589_p3 = pneg %p588_p6 }
  0x22   : > { %p595_p11 = por %p594_p10, %p593_p7 }
  0x24   : > { %p596_p13 = pnand %p595_p11, %p589_p3 }
  0x26   : > { %599 = shalt.err (!%p596_p13)
}
  0x27   : > { %491 = dma.hbm_to_vmem [thread:$0]  (!%p838_p0), %s145_s22, 16, %s148_s5, %s136_s21  }
  0x28   : > { %p859_p5 = pnand %p473_p1, %p171_p2  ;;  %s164_s18 = scalar_lea.hbm %s972_s1, %s470_s7 }
  0x29   : > { %s157_s26 = scalar_lea.vmem [#allocation5], %s828_s29  ;;  %s155_s27 = scalar_lea.sflag [#allocation6], %s828_s29 }
  0x2a   : > { %s166_s23 = sshll.u32 %s157_s26, 4  ;;  %s731_s5 = smov [#allocation5]   ;;  %s167_s23 = int_to_ptr.vmem [resolvable:$true] %s166_s23 }
  0x2b   : > { %s613_s3 = scalar_lea.vmem %s167_s23, 16  ;;  %s618_s22 = sshll.u32 %s731_s5, 4  ;;  %s619_s22 = int_to_ptr.vmem [resolvable:$false] %s618_s22 }
  0x2c   : > { %p614_p6 = scmp.ne.s32.totalorder %s167_s23, %s613_s3  ;;  %s620_s21 = scalar_lea.vmem %s619_s22, 32 }
  0x2d   : > { %p621_p1 = scmp.lt.s32.totalorder %s167_s23, %s619_s22  ;;  %p622_p2 = scmp.lt.s32.totalorder %s620_s21, %s613_s3 }
  0x2e   : > { %p616_p3 = pnand %p614_p6, %p574_p4 }
  0x2f   : > { %p623_p10 = por %p622_p2, %p621_p1 }
  0x30   : > { %p617_p7 = pneg %p616_p3 }
  0x32   : > { %p624_p11 = pnand %p623_p10, %p617_p7 }
  0x34   : > { %627 = shalt.err (!%p624_p11)
}
  0x35   : > { %494 = dma.hbm_to_vmem [thread:$0]  (!%p838_p0), %s164_s18, 16, %s167_s23, %s155_s27  }
  0x36   : > { %175 = sbr.rel (%p859_p5) target bundleno = 154 (0x9a), region = 28  ;;  %s876_s29 = sand.u32 (!%p859_p5), 1, %s704_s10  }
  0x37   : > { %s178_s7 = scalar_lea.sflag (!%p859_p5), [#allocation3], %s876_s29  ;;  %s180_s6 = scalar_lea.vmem (!%p859_p5), [#allocation2], %s876_s29 }
  0x3b   : > { %687 = dma.done.wait (%p812_p8), %s178_s7, 16  }
  0x3c   : > { %689 = vsyncadd (%p812_p8), %s178_s7, 4294967280  ;;  %s186_s8 = scalar_lea.sflag [#allocation6], %s876_s29  ;;  %s188_s17 = scalar_lea.vmem [#allocation5], %s876_s29 }
  0x3d   : > { %691 = dma.done.wait (%p812_p8), %s186_s8, 16  }
  0x3e   : > { %693 = vsyncadd (%p812_p8), %s186_s8, 4294967280  ;;  %v212_v0 = vlaneseq  ;;  %v475_v17 = vld [vmem:[%s180_s6] ss:$0 sm:$0xff]  ;;  %s474_s24 = sshll.u32 %s876_s29, 5  ;;  %s478_s4 = sshll.u32 %s716_s13, 3 }
  0x3f   : > { %v476_v18 = vld [vmem:[%s188_s17] ss:$0 sm:$0xff]  ;;  %s355_s18 = sadd.s32 %s712_s12, %s478_s4  ;;  %s211_s26 = scalar_lea.vmem [#allocation7], %s474_s24 }
  0x40   : > { %v213_v1 = vshrl.u32 %v212_v0, 7  ;;  %s358_s23 = sshll.u32 %s211_s26, 4  ;;  %s479_s27 = sshll.u32 %s355_s18, 7  ;;  %s911_s23 = int_to_ptr.vmem [resolvable:$true] %s358_s23 }
  0x41   : > { %s917_s3 = scalar_lea.hbm %s973_s2, %s479_s27  ;;  %s344_s5 = scalar_lea.sflag [#allocation4], %s876_s29 }
  0x42   : > { %v215_v2 = vcvt.s32.f32 %v213_v1  ;;  %v214_v3 = vadd.s32 8, %v213_v1  ;;  %s628_s22 = scalar_lea.vmem %s911_s23, 512  ;;  %s732_s21 = smov [#allocation7]  }
  0x43   : > { %p629_p8 = scmp.ne.s32.totalorder %s911_s23, %s628_s22  ;;  %s632_s7 = sshll.u32 %s732_s21, 4  ;;  %s633_s7 = int_to_ptr.vmem [resolvable:$false] %s632_s7 }
  0x44   : > { %v217_v4 = vmul.f32 0.5, %v215_v2  ;;  %v216_v5 = vcvt.s32.f32 %v214_v3  ;;  %s634_s6 = scalar_lea.vmem %s633_s7, 1024  ;;  %p635_p13 = scmp.lt.s32.totalorder %s911_s23, %s633_s7 }
  0x45   : > { %p630_p0 = pnand %p629_p8, %p816_p9  ;;  %p636_p5 = scmp.lt.s32.totalorder %s634_s6, %s628_s22 }
  0x46   : > { %v219_v6 = vfloor.f32 %v217_v4  ;;  %v218_v7 = vmul.f32 0.5, %v216_v5 }
  0x47   : > { %p631_p4 = pneg %p630_p0  ;;  %p637_p6 = por %p636_p5, %p635_p13 }
  0x48   : > { %v221_v8 = vmul.f32 -1.1512926, %v219_v6  ;;  %v220_v9 = vfloor.f32 %v218_v7  ;;  %v227_v13 = vmul.f32 2.0, %v219_v6 }
  0x49   : > { %p638_p3 = pnand %p637_p6, %p631_p4 }
  0x4a   : > { %v223_v10 = vmul.f32 1.442695, %v221_v8  ;;  %v222_v11 = vmul.f32 -1.1512926, %v220_v9  ;;  %v228_v14 = vmul.f32 2.0, %v220_v9  ;;  %v229_v15 = vsub.f32 %v215_v2, %v227_v13 }
  0x4c   : > { %568 = vpow2.f32 %v223_v10  ;;  %v225_v12 = vmul.f32 1.442695, %v222_v11  ;;  %v230_v16 = vsub.f32 %v216_v5, %v228_v14  ;;  %v231_v19 = vmul.f32 1.5707964, %v229_v15 }
  0x4e   : > { %570 = vpow2.f32 %v225_v12  ;;  %v232_v22 = vmul.f32 1.5707964, %v230_v16 }
  0x59   : > { %v569_v20 = vpop.eup %568 }
  0x5a   : > { %v241_v21 = vmul.f32 %v569_v20, %v475_v17  ;;  %v295_v23 = vmul.f32 %v569_v20, %v476_v18 }
  0x5b   : > { %v571_v24 = vpop.eup %570 }
  0x5c   : > { %v243_v25 = vadd.f32 %v241_v21, %v231_v19  ;;  %v242_v26 = vmul.f32 %v571_v24, %v475_v17  ;;  %v297_v27 = vadd.f32 %v295_v23, %v231_v19  ;;  %v296_v28 = vmul.f32 %v571_v24, %v476_v18 }
  0x5e   : > { %v245_v29 = vmul.f32 0.15915494, %v243_v25  ;;  %v244_v30 = vadd.f32 %v242_v26, %v232_v22  ;;  %v299_v31 = vmul.f32 0.15915494, %v297_v27  ;;  %v298_v32 = vadd.f32 %v296_v28, %v232_v22 }
  0x60   : > { %v247_v33 = vadd.f32 0.5, %v245_v29  ;;  %v246_v34 = vmul.f32 0.15915494, %v244_v30  ;;  %v301_v35 = vadd.f32 0.5, %v299_v31  ;;  %v300_v36 = vmul.f32 0.15915494, %v298_v32 }
  0x62   : > { %v249_v37 = vfloor.f32 %v247_v33  ;;  %v248_v38 = vadd.f32 0.5, %v246_v34  ;;  %v303_v39 = vfloor.f32 %v301_v35  ;;  %v302_v40 = vadd.f32 0.5, %v300_v36 }
  0x64   : > { %v251_v41 = vmul.f32 6.2831855, %v249_v37  ;;  %v250_v42 = vfloor.f32 %v248_v38  ;;  %v305_v43 = vmul.f32 6.2831855, %v303_v39  ;;  %v304_v44 = vfloor.f32 %v302_v40 }
  0x66   : > { %v890_v45 = vsub.f32 %v243_v25, %v251_v41  ;;  %v252_v46 = vmul.f32 6.2831855, %v250_v42  ;;  %v892_v47 = vsub.f32 %v297_v27, %v305_v43  ;;  %v306_v48 = vmul.f32 6.2831855, %v304_v44 }
  0x68   : > { %v255_v49 = vmul.f32 %v890_v45, %v890_v45  ;;  %v896_v50 = vsub.f32 %v244_v30, %v252_v46  ;;  %v309_v51 = vmul.f32 %v892_v47, %v892_v47  ;;  %v900_v52 = vsub.f32 %v298_v32, %v306_v48 }
  0x6a   : > { %v257_v53 = vmul.f32 -7.6471636e-13, %v255_v49  ;;  %v256_v54 = vmul.f32 %v896_v50, %v896_v50  ;;  %v311_v55 = vmul.f32 -7.6471636e-13, %v309_v51  ;;  %v310_v56 = vmul.f32 %v900_v52, %v900_v52 }
  0x6c   : > { %v259_v57 = vadd.f32 1.6059044e-10, %v257_v53  ;;  %v258_v58 = vmul.f32 -7.6471636e-13, %v256_v54  ;;  %v313_v59 = vadd.f32 1.6059044e-10, %v311_v55 }
  0x6d   : > { %v312_v60 = vmul.f32 -7.6471636e-13, %v310_v56 }
  0x6e   : > { %v261_v61 = vmul.f32 %v259_v57, %v255_v49  ;;  %v260_v62 = vadd.f32 1.6059044e-10, %v258_v58  ;;  %v315_v63 = vmul.f32 %v313_v59, %v309_v51 }
  0x6f   : > { %v314_v0 = vadd.f32 1.6059044e-10, %v312_v60 }
  0x70   : > { %v263_v1 = vadd.f32 -2.5052108e-08, %v261_v61  ;;  %v262_v2 = vmul.f32 %v260_v62, %v256_v54  ;;  %v317_v3 = vadd.f32 -2.5052108e-08, %v315_v63 }
  0x71   : > { %v316_v4 = vmul.f32 %v314_v0, %v310_v56 }
  0x72   : > { %v265_v5 = vmul.f32 %v263_v1, %v255_v49  ;;  %v264_v6 = vadd.f32 -2.5052108e-08, %v262_v2  ;;  %v319_v7 = vmul.f32 %v317_v3, %v309_v51 }
  0x73   : > { %v318_v8 = vadd.f32 -2.5052108e-08, %v316_v4 }
  0x74   : > { %v267_v9 = vadd.f32 2.7557319e-06, %v265_v5  ;;  %v266_v10 = vmul.f32 %v264_v6, %v256_v54  ;;  %v321_v11 = vadd.f32 2.7557319e-06, %v319_v7 }
  0x75   : > { %v320_v12 = vmul.f32 %v318_v8, %v310_v56 }
  0x76   : > { %v269_v13 = vmul.f32 %v267_v9, %v255_v49  ;;  %v268_v14 = vadd.f32 2.7557319e-06, %v266_v10  ;;  %v323_v15 = vmul.f32 %v321_v11, %v309_v51 }
  0x77   : > { %v322_v16 = vadd.f32 2.7557319e-06, %v320_v12 }
  0x78   : > { %v271_v17 = vadd.f32 -0.0001984127, %v269_v13  ;;  %v270_v18 = vmul.f32 %v268_v14, %v256_v54  ;;  %v325_v19 = vadd.f32 -0.0001984127, %v323_v15 }
  0x79   : > { %v324_v20 = vmul.f32 %v322_v16, %v310_v56 }
  0x7a   : > { %v273_v21 = vmul.f32 %v271_v17, %v255_v49  ;;  %v272_v22 = vadd.f32 -0.0001984127, %v270_v18  ;;  %v327_v23 = vmul.f32 %v325_v19, %v309_v51 }
  0x7b   : > { %v326_v24 = vadd.f32 -0.0001984127, %v324_v20 }
  0x7c   : > { %v275_v25 = vadd.f32 0.008333334, %v273_v21  ;;  %v274_v26 = vmul.f32 %v272_v22, %v256_v54  ;;  %v329_v27 = vadd.f32 0.008333334, %v327_v23 }
  0x7d   : > { %v328_v28 = vmul.f32 %v326_v24, %v310_v56 }
  0x7e   : > { %v277_v29 = vmul.f32 %v275_v25, %v255_v49  ;;  %v276_v30 = vadd.f32 0.008333334, %v274_v26  ;;  %v331_v31 = vmul.f32 %v329_v27, %v309_v51 }
  0x7f   : > { %v330_v32 = vadd.f32 0.008333334, %v328_v28 }
  0x80   : > { %v279_v33 = vadd.f32 -0.16666667, %v277_v29  ;;  %v278_v34 = vmul.f32 %v276_v30, %v256_v54  ;;  %v333_v35 = vadd.f32 -0.16666667, %v331_v31 }
  0x81   : > { %v332_v36 = vmul.f32 %v330_v32, %v310_v56 }
  0x82   : > { %v281_v37 = vmul.f32 %v279_v33, %v255_v49  ;;  %v280_v38 = vadd.f32 -0.16666667, %v278_v34  ;;  %v335_v39 = vmul.f32 %v333_v35, %v309_v51 }
  0x83   : > { %v334_v40 = vadd.f32 -0.16666667, %v332_v36 }
  0x84   : > { %v283_v41 = vadd.f32 1.0, %v281_v37  ;;  %v282_v42 = vmul.f32 %v280_v38, %v256_v54  ;;  %v337_v43 = vadd.f32 1.0, %v335_v39 }
  0x85   : > { %v336_v44 = vmul.f32 %v334_v40, %v310_v56 }
  0x86   : > { %v285_v46 = vmul.f32 %v283_v41, %v890_v45  ;;  %v284_v48 = vadd.f32 1.0, %v282_v42  ;;  %v339_v53 = vmul.f32 %v337_v43, %v892_v47 }
  0x87   : > { %v338_v49 = vadd.f32 1.0, %v336_v44 }
  0x88   : > { %287 = vst [vmem:[%s211_s26] sm:$0xff] %v285_v46  ;;  %v286_v51 = vmul.f32 %v284_v48, %v896_v50  ;;  %341 = vst [vmem:[%s211_s26 + $0x10] sm:$0xff] %v339_v53 }
  0x89   : > { %v340_v45 = vmul.f32 %v338_v49, %v900_v52 }
  0x8a   : > { %288 = vst [vmem:[%s211_s26 + $0x8] sm:$0xff] %v286_v51 }
  0x8b   : > { %342 = vst [vmem:[%s211_s26 + $0x18] sm:$0xff] %v340_v45 }
  0x8c   : > { %641 = shalt.err (!%p638_p3)
}
  0x8d   : > { %s642_s8 = scalar_lea.hbm %s917_s3, 512  ;;  %s646_s4 = scalar_lea.hbm %s973_s2, 2048 }
  0x8e   : > { %p643_p7 = scmp.ne.s32.totalorder %s917_s3, %s642_s8  ;;  %p647_p10 = scmp.lt.s32.totalorder %s917_s3, %s973_s2 }
  0x8f   : > { %p648_p11 = scmp.lt.s32.totalorder %s646_s4, %s642_s8 }
  0x90   : > { %p644_p1 = pnand %p643_p7, %p816_p9 }
  0x91   : > { %p649_p8 = por %p648_p11, %p647_p10 }
  0x92   : > { %p645_p2 = pneg %p644_p1 }
  0x94   : > { %p650_p0 = pnand %p649_p8, %p645_p2 }
  0x96   : > { %653 = shalt.err (!%p650_p0)
}
  0x97   : > { %s733_s27 = smov 128   ;;  %s734_s12 = smov 256  }
  0x98   : > { %s735_s13 = smov 8  }
  0x99   : > { %486 = dma.vmem_to_hbm [thread:$0]  (%p816_p9), %s911_s23, 512, %s917_s3, %s344_s5, %s733_s27, %s734_s12, %s735_s13  }
  0x9a PF: > { %p500_p4 = scmp.ge.s32.totalorder %s728_s16, 2  ;;  %s373_s22 = sand.u32 1, %s700_s9  }
  0x9b   : > { %s374_s21 = scalar_lea.sflag [#allocation4], %s373_s22 }
  0x9c   : > { %p496_p13 = pnand %p500_p4, %p822_p12 }
  0x9e   : > { %p497_p5 = pneg %p496_p13 }
  0xa0   : > { %695 = dma.done.wait (%p497_p5), %s374_s21, 512  }
  0xa1   : > { %697 = vsyncadd (%p497_p5), %s374_s21, 4294966784  ;;  %s21_s16 = sadd.s32 1, %s728_s16   ;;  %s980_s9 = smov %s704_s10 }
  0xa2   : > { %p18_p6 = scmp.ge.s32.totalorder %s21_s16, 6   ;;  %s981_s10 = smov %s708_s11 }
  0xa3   : > { %s982_s11 = smov %s831_s30  ;;  %s983_s12 = smov %s720_s14 }
  0xa4   : > { %s984_s13 = smov %s724_s15  ;;  %s985_s14 = smov %s988_s19 }
  0xa5   : > { %s986_s15 = smov %s992_s20  ;;  %20 = sbr.rel (!%p18_p6) target bundleno = 9 (0x9), region = 86 }
  0xaa   :  { %379 = vsyncpa [#allocation3], 1 }
  0xab   :  { %381 = vsyncpa [#allocation3 + $0x1], 1 }
  0xac   :  { %382 = vsyncpa [#allocation6], 1 }
  0xad   :  { %384 = vsyncpa [#allocation6 + $0x1], 1 }
  0xae   :  { %385 = vsyncpa [#allocation4], 1 }
  0xaf   :  { %387 = vsyncpa [#allocation4 + $0x1], 1 }

</bundles_post_ra>
